<compile_context>
chip_gen: v5e
topology: v5e:2x2
jax: 0.10.0
libtpu: 0.0.40
codegen_flags: <defaults>
</compile_context>

<pallas_src>
import math

import jax
import jax.numpy as jnp
from jax.experimental import pallas as pl
from jax.experimental.pallas import tpu as pltpu


def _bilinear_weight_matrix(out_size: int, in_size: int) -> jnp.ndarray:
    """Row-interpolation matrix matching torch interpolate(align_corners=False)."""
    scale = in_size / out_size
    o = jnp.arange(out_size, dtype=jnp.float32)
    src = (o + 0.5) * scale - 0.5
    src = jnp.clip(src, 0.0, float(in_size - 1))   # PyTorch clamps negative coords
    lo = jnp.floor(src).astype(jnp.int32)
    hi = jnp.minimum(lo + 1, in_size - 1)
    frac = src - lo.astype(jnp.float32)
    rows = jnp.arange(out_size)
    w = jnp.zeros((out_size, in_size), jnp.float32)
    w = w.at[rows, lo].add(1.0 - frac)
    w = w.at[rows, hi].add(frac)
    return w


def _interp_kernel(wh_ref, wbd_ref, x_ref, o_ref):
    # wh_ref : (H_out, H_in)           -- f32 H-interp weights (resident)
    # wbd_ref: (B*W_in, B*W_out)       -- f32 kron(I_B, Ww^T) (resident)
    # x_ref  : (H_in, B*W_in)          -- B images packed along lanes, native dtype
    # o_ref  : (H_out, B*W_out)        -- lane-dense output block
    t = jnp.dot(wh_ref[...], x_ref[...], preferred_element_type=jnp.float32)
    out = jnp.dot(t, wbd_ref[...], preferred_element_type=jnp.float32)
    o_ref[...] = out.astype(o_ref.dtype)


def _pick_block_batch(nc, w_in, w_out, target_lanes=1024, max_bd_bytes=4 << 20):
    """Choose B (#images per grid step).

    Constraints: B*W_in and B*W_out must be multiples of 128 so every block is
    lane-aligned and loads/stores are lane-dense; B*W_in targets a wide MXU
    operand; the block-diagonal weight (B*W_in, B*W_out) must stay small in
    VMEM (conservative for v7x's 64 MiB).
    """
    b_unit = math.lcm(128 // math.gcd(128, w_in), 128 // math.gcd(128, w_out))
    b = b_unit
    while True:
        nb = b + b_unit
        if nb * w_in > target_lanes:
            break
        if (nb * w_in) * (nb * w_out) * 4 > max_bd_bytes:
            break
        if nb > max(b_unit, nc):
            break
        b = nb
    return b


def interpolate_bilinear(x: jnp.ndarray, size, mode: str = "bilinear") -> jnp.ndarray:
    """Pallas equivalent of nn.functional.interpolate(x, size, mode, align_corners=False).

    x: (N, C, H_in, W_in). Returns (N, C, H_out, W_out).
    """
    assert mode == "bilinear", "only bilinear mode implemented"
    n, c, h_in, w_in = x.shape
    h_out, w_out = size
    nc = n * c

    # Interpolation matrices stay in f32 for fractional-offset precision.
    wh = _bilinear_weight_matrix(h_out, h_in)                 # (H_out, H_in)
    wwt = _bilinear_weight_matrix(w_out, w_in).T              # (W_in, W_out), pre-transposed

    b = _pick_block_batch(nc, w_in, w_out)
    nc_pad = -(-nc // b) * b
    grid_len = nc_pad // b

    # Block-diagonal W-interp weight: the per-image right-multiply by Ww^T
    # becomes one dense GEMM over all B images (no in-kernel reshape/relayout).
    wbd = jnp.kron(jnp.eye(b, dtype=jnp.float32), wwt)        # (B*W_in, B*W_out)

    # One-time wrapper-side layout plumbing: (NC,H,W) -> (H_in, NCpad*W_in).
    xt = jnp.transpose(x.reshape(nc, h_in, w_in), (1, 0, 2))  # (H_in, NC, W_in)
    if nc_pad != nc:
        xt = jnp.pad(xt, ((0, 0), (0, nc_pad - nc), (0, 0)))
    xt = xt.reshape(h_in, nc_pad * w_in)

    cost = pl.CostEstimate(
        flops=2 * nc * (h_out * h_in * w_in + h_out * w_in * w_out),
        transcendentals=0,
        bytes_accessed=nc * (h_in * w_in + h_out * w_out) * x.dtype.itemsize
        + (int(wh.size) + int(wbd.size)) * 4,
    )

    out_flat = pl.pallas_call(
        _interp_kernel,
        out_shape=jax.ShapeDtypeStruct((h_out, nc_pad * w_out), x.dtype),
        grid_spec=pltpu.PrefetchScalarGridSpec(
            num_scalar_prefetch=0,
            grid=(grid_len,),
            in_specs=[
                pl.BlockSpec((h_out, h_in), lambda i: (0, 0)),
                pl.BlockSpec((b * w_in, b * w_out), lambda i: (0, 0)),
                pl.BlockSpec((h_in, b * w_in), lambda i: (0, i)),
            ],
            out_specs=pl.BlockSpec((h_out, b * w_out), lambda i: (0, i)),
        ),
        compiler_params=pltpu.CompilerParams(
            dimension_semantics=("parallel",),
            vmem_limit_bytes=64 * 1024 * 1024,
        ),
        cost_estimate=cost,
    )(wh, wbd, xt)

    # (H_out, NCpad*W_out) -> (N, C, H_out, W_out)
    out = out_flat.reshape(h_out, nc_pad, w_out)[:, :nc, :]
    out = jnp.transpose(out, (1, 0, 2)).reshape(n, c, h_out, w_out)
    return out


if __name__ == "__main__":
    # Module "parameters": size and mode (Interpolate has no learnable weights).
    size = (32, 32)
    mode = "bilinear"

    key = jax.random.PRNGKey(0)
    x = jax.random.normal(key, (2, 4, 16, 16), dtype=jnp.float32)

    out = interpolate_bilinear(x, size, mode)
    out = jax.block_until_ready(out)

    # Internal consistency check against the same weight matrices in plain JAX.
    wh = _bilinear_weight_matrix(size[0], x.shape[2])
    ww = _bilinear_weight_matrix(size[1], x.shape[3])
    ref = jnp.einsum("oh,nchw,pw->ncop", wh, x, ww)
    assert out.shape == (2, 4, 32, 32)
    assert jnp.allclose(out, ref, atol=1e-5, rtol=1e-5)

    print("KERNEL_OK")
</pallas_src>

<mosaic_0001>
module attributes {stable_mosaic.version = 11 : i64} {
  func.func @_interp_kernel(%arg0: i32, %arg1: memref<32x16xf32, #tpu.memory_space<vmem>>, %arg2: memref<128x256xf32, #tpu.memory_space<vmem>>, %arg3: memref<16x128xf32, #tpu.memory_space<vmem>>, %arg4: memref<32x256xf32, #tpu.memory_space<vmem>>) attributes {dimension_semantics = [#tpu.dimension_semantics<parallel>], iteration_bounds = array<i64: 1>, scalar_prefetch = 0 : i64, scratch_operands = 0 : i64, tpu.core_type = #tpu.core_type<tc>, window_params = [{pipeline_mode = #tpu.pipeline_mode<synchronous>, transform_indices = @transform_0, window_bounds = array<i64: 32, 16>}, {pipeline_mode = #tpu.pipeline_mode<synchronous>, transform_indices = @transform_1, window_bounds = array<i64: 128, 256>}, {transform_indices = @transform_2, window_bounds = array<i64: 16, 128>}, {transform_indices = @transform_3, window_bounds = array<i64: 32, 256>}]} {
    %c0 = arith.constant 0 : index
    %c0_0 = arith.constant 0 : index
    %0 = vector.load %arg1[%c0, %c0_0] : memref<32x16xf32, #tpu.memory_space<vmem>>, vector<32x16xf32>
    %c0_1 = arith.constant 0 : index
    %c0_2 = arith.constant 0 : index
    %1 = vector.load %arg3[%c0_1, %c0_2] : memref<16x128xf32, #tpu.memory_space<vmem>>, vector<16x128xf32>
    %cst = arith.constant dense<0.000000e+00> : vector<32x128xf32>
    %2 = tpu.matmul %0, %1, %cst {dimension_numbers = #tpu.dot_dimension_numbers<[1], [0], [0], [1], [0, 0, 1, 1], [], []>} : vector<32x16xf32>, vector<16x128xf32>, vector<32x128xf32> -> vector<32x128xf32>
    %c0_3 = arith.constant 0 : index
    %c0_4 = arith.constant 0 : index
    %3 = vector.load %arg2[%c0_3, %c0_4] : memref<128x256xf32, #tpu.memory_space<vmem>>, vector<128x256xf32>
    %cst_5 = arith.constant dense<0.000000e+00> : vector<32x256xf32>
    %4 = tpu.matmul %2, %3, %cst_5 {dimension_numbers = #tpu.dot_dimension_numbers<[1], [0], [0], [1], [0, 0, 1, 1], [], []>} : vector<32x128xf32>, vector<128x256xf32>, vector<32x256xf32> -> vector<32x256xf32>
    %c0_6 = arith.constant 0 : index
    %c0_7 = arith.constant 0 : index
    %5 = vector.load %arg4[%c0_6, %c0_7] : memref<32x256xf32, #tpu.memory_space<vmem>>, vector<32x256xf32>
    tpu.vector_store %arg4[%c0_6, %c0_7], %4 {strides = array<i32>} : memref<32x256xf32, #tpu.memory_space<vmem>>, vector<32x256xf32>,
    return
  }
  func.func @transform_0(%arg0: i32) -> (i32, i32) {
    %c0_i32 = arith.constant 0 : i32
    %c0_i32_0 = arith.constant 0 : i32
    %c0_i32_1 = arith.constant 0 : i32
    return %c0_i32, %c0_i32_0 : i32, i32
  }
  func.func @transform_1(%arg0: i32) -> (i32, i32) {
    %c0_i32 = arith.constant 0 : i32
    %c0_i32_0 = arith.constant 0 : i32
    %c0_i32_1 = arith.constant 0 : i32
    return %c0_i32, %c0_i32_0 : i32, i32
  }
  func.func @transform_2(%arg0: i32) -> (i32, i32) {
    %c0_i32 = arith.constant 0 : i32
    %c0_i32_0 = arith.constant 0 : i32
    return %c0_i32, %arg0 : i32, i32
  }
  func.func @transform_3(%arg0: i32) -> (i32, i32) {
    %c0_i32 = arith.constant 0 : i32
    %c0_i32_0 = arith.constant 0 : i32
    return %c0_i32, %arg0 : i32, i32
  }
}

</mosaic_0001>

<bundles_post_ra>
// kernel: tpu_custom_call.1
= control target key start
LH: loop header
LB: loop body
LE: loop exit
PB: predicated region body
PF: predicated region fallthrough
CT: control target
= control target key end

     0   :  { %8 = vsyncpa [#allocation3], 0  ;;  %s346_s0 = inlined_call_operand.vmem [shape: f32[32,16], index: 0, kind: input, shape index: {}]   ;;  %s347_s1 = inlined_call_operand.hbm [shape: f32[128,256], index: 1, kind: input, shape index: {}]   ;;  %s348_s2 = inlined_call_operand.vmem [shape: f32[16,128], index: 2, kind: input, shape index: {}]   ;;  %s349_s3 = inlined_call_operand.hbm [shape: f32[32,256], index: 3, kind: output, shape index: {}]  }
   0x1   :  { %9 = vsyncpa [#allocation4], 0  ;;  %s16_s14 = sshll.u32 %s347_s1, 4  ;;  %s288_s15 = smov [#allocation2]   ;;  %s17_s14 = int_to_ptr.hbm [resolvable:$true] %s16_s14 }
   0x2   :  { %s18_s16 = sshll.u32 %s288_s15, 4  ;;  %s289_s17 = smov 256   ;;  %s19_s16 = int_to_ptr.vmem [resolvable:$true] %s18_s16 }
   0x3   :  { %s290_s18 = smov 16  }
   0x4   :  { %24 = dma.hbm_to_vmem [thread:$0]  %s17_s14, 4096, %s19_s16, [#allocation3], %s289_s17, %s289_s17, %s290_s18  }
   0x5   :  { %284 = dma.done.wait [#allocation3], 4096  }
   0x6   :  { %285 = vsyncadd [#allocation3], 4294963200  ;;  %v36_v0 = vld [vmem:[%s348_s2 + $0x8] sm:$0xff]  ;;  %v35_v1 = vld [vmem:[%s348_s2] sm:$0xff]  ;;  %vm37_vm0 = vcmask 130048   ;;  %s183_s5 = sshll.u32 %s349_s3, 4  ;;  %s184_s5 = int_to_ptr.hbm [resolvable:$true] %s183_s5 }
   0x7   :  { %64 = vmatpush.msra.mxu0 %v36_v0  ;;  %v31_v2 = vld [vmem:[%s346_s0] sm:$0xff]  ;;  %v109_v3 = vld [vmem:[#allocation2 + $0xf0] sm:$0xff]  ;;  %v110_v4 = vld [vmem:[#allocation2 + $0xf8] sm:$0xff] }
   0x8   :  { %v107_v5 = vld [vmem:[#allocation2 + $0xe0] sm:$0xff]  ;;  %111 = vmatpush.msra.mxu1 %v109_v3  ;;  %v108_v6 = vld [vmem:[#allocation2 + $0xe8] sm:$0xff]  ;;  %v105_v7 = vld [vmem:[#allocation2 + $0xd0] sm:$0xff]  ;;  %200 = vmatpush.msra.mxu3 %v109_v3 }
   0x9   :  { %65 = vmatpush.msra.mxu0 %v35_v1  ;;  %v106_v8 = vld [vmem:[#allocation2 + $0xd8] sm:$0xff]  ;;  %v103_v9 = vld [vmem:[#allocation2 + $0xc0] sm:$0xff]  ;;  %216 = vmatpush.msra.mxu2 %v110_v4  ;;  %v104_v10 = vld [vmem:[#allocation2 + $0xc8] sm:$0xff] }
   0xa   :  { %196 = vmatmul.msk.f32.vlgmr.msra.gmra.mxu0 %vm37_vm0, %v31_v2  ;;  %112 = vmatpush.msra.mxu1 %v107_v5  ;;  %v101_v11 = vld [vmem:[#allocation2 + $0xb0] sm:$0xff]  ;;  %v32_v12 = vld [vmem:[%s346_s0 + $0x8] sm:$0xff]  ;;  %v102_v13 = vld [vmem:[#allocation2 + $0xb8] sm:$0xff] }
   0xb   :  { %140 = vmatpush.msrb.mxu0 %v110_v4  ;;  %201 = vmatpush.msra.mxu3 %v107_v5  ;;  %v99_v14 = vld [vmem:[#allocation2 + $0xa0] sm:$0xff]  ;;  %v100_v15 = vld [vmem:[#allocation2 + $0xa8] sm:$0xff]  ;;  %v97_v16 = vld [vmem:[#allocation2 + $0x90] sm:$0xff] }
   0xc   :  { %113 = vmatpush.msra.mxu1 %v105_v7  ;;  %217 = vmatpush.msra.mxu2 %v108_v6  ;;  %v98_v17 = vld [vmem:[#allocation2 + $0x98] sm:$0xff]  ;;  %v95_v18 = vld [vmem:[#allocation2 + $0x80] sm:$0xff]  ;;  %v96_v19 = vld [vmem:[#allocation2 + $0x88] sm:$0xff] }
   0xd   :  { %141 = vmatpush.msrb.mxu0 %v108_v6  ;;  %202 = vmatpush.msra.mxu3 %v105_v7  ;;  %v93_v20 = vld [vmem:[#allocation2 + $0x70] sm:$0xff]  ;;  %v94_v22 = vld [vmem:[#allocation2 + $0x78] sm:$0xff]  ;;  %v91_v23 = vld [vmem:[#allocation2 + $0x60] sm:$0xff] }
   0xe   :  { %114 = vmatpush.msra.mxu1 %v103_v9  ;;  %218 = vmatpush.msra.mxu2 %v106_v8  ;;  %v33_v21 = vld [vmem:[%s346_s0 + $0x10] sm:$0xff]  ;;  %v92_v24 = vld [vmem:[#allocation2 + $0x68] sm:$0xff]  ;;  %v90_v26 = vld [vmem:[#allocation2 + $0x58] sm:$0xff] }
   0xf   :  { %142 = vmatpush.msrb.mxu0 %v106_v8  ;;  %203 = vmatpush.msra.mxu3 %v103_v9  ;;  %v89_v25 = vld [vmem:[#allocation2 + $0x50] sm:$0xff]  ;;  %v87_v27 = vld [vmem:[#allocation2 + $0x40] sm:$0xff]  ;;  %v88_v28 = vld [vmem:[#allocation2 + $0x48] sm:$0xff] }
  0x10   :  { %115 = vmatpush.msra.mxu1 %v101_v11  ;;  %219 = vmatpush.msra.mxu2 %v104_v10  ;;  %v85_v29 = vld [vmem:[#allocation2 + $0x30] sm:$0xff]  ;;  %v34_v30 = vld [vmem:[%s346_s0 + $0x18] sm:$0xff]  ;;  %v83_v32 = vld [vmem:[#allocation2 + $0x20] sm:$0xff]  ;;  %s291_s0 = smov [#allocation5]  }
  0x11   :  { %143 = vmatpush.msrb.mxu0 %v104_v10  ;;  %204 = vmatpush.msra.mxu3 %v101_v11  ;;  %v86_v31 = vld [vmem:[#allocation2 + $0x38] sm:$0xff]  ;;  %v84_v33 = vld [vmem:[#allocation2 + $0x28] sm:$0xff]  ;;  %v81_v34 = vld [vmem:[#allocation2 + $0x10] sm:$0xff]  ;;  %s181_s29 = sshll.u32 %s291_s0, 4  ;;  %s182_s29 = int_to_ptr.vmem [resolvable:$true] %s181_s29 }
  0x12   :  { %197 = vmatmul.msk.f32.gmra.mxu0 %vm37_vm0, %v32_v12  ;;  %116 = vmatpush.msra.mxu1 %v99_v14  ;;  %v82_v35 = vld [vmem:[#allocation2 + $0x18] sm:$0xff]  ;;  %v79_v36 = vld [vmem:[#allocation2] sm:$0xff]  ;;  %v80_v37 = vld [vmem:[#allocation2 + $0x8] sm:$0xff] }
  0x13   :  { %144 = vmatpush.msrb.mxu0 %v102_v13  ;;  %220 = vmatpush.msra.mxu2 %v102_v13 }
  0x14   :  { %117 = vmatpush.msra.mxu1 %v97_v16  ;;  %205 = vmatpush.msra.mxu3 %v99_v14 }
  0x15   :  { %145 = vmatpush.msrb.mxu0 %v100_v15  ;;  %221 = vmatpush.msra.mxu2 %v100_v15 }
  0x16   :  { %118 = vmatpush.msra.mxu1 %v95_v18  ;;  %206 = vmatpush.msra.mxu3 %v97_v16 }
  0x17   :  { %146 = vmatpush.msrb.mxu0 %v98_v17  ;;  %222 = vmatpush.msra.mxu2 %v98_v17 }
  0x18   :  { %119 = vmatpush.msra.mxu1 %v93_v20  ;;  %207 = vmatpush.msra.mxu3 %v95_v18 }
  0x19   :  { %147 = vmatpush.msrb.mxu0 %v96_v19  ;;  %223 = vmatpush.msra.mxu2 %v96_v19 }
  0x1a   :  { %198 = vmatmul.msk.f32.gmra.mxu0 %vm37_vm0, %v33_v21  ;;  %120 = vmatpush.msra.mxu1 %v91_v23 }
  0x1b   :  { %148 = vmatpush.msrb.mxu0 %v94_v22  ;;  %208 = vmatpush.msra.mxu3 %v93_v20 }
  0x1c   :  { %121 = vmatpush.msra.mxu1 %v89_v25  ;;  %224 = vmatpush.msra.mxu2 %v94_v22 }
  0x1d   :  { %149 = vmatpush.msrb.mxu0 %v92_v24  ;;  %209 = vmatpush.msra.mxu3 %v91_v23 }
  0x1e   :  { %122 = vmatpush.msra.mxu1 %v87_v27  ;;  %225 = vmatpush.msra.mxu2 %v92_v24 }
  0x1f   :  { %150 = vmatpush.msrb.mxu0 %v90_v26  ;;  %210 = vmatpush.msra.mxu3 %v89_v25 }
  0x20   :  { %123 = vmatpush.msra.mxu1 %v85_v29  ;;  %226 = vmatpush.msra.mxu2 %v90_v26 }
  0x21   :  { %151 = vmatpush.msrb.mxu0 %v88_v28  ;;  %211 = vmatpush.msra.mxu3 %v87_v27 }
  0x22   :  { %199 = vmatmul.msk.f32.gmra.mxu0 %vm37_vm0, %v34_v30  ;;  %124 = vmatpush.msra.mxu1 %v83_v32 }
  0x23   :  { %152 = vmatpush.msrb.mxu0 %v86_v31  ;;  %227 = vmatpush.msra.mxu2 %v88_v28 }
  0x24   :  { %125 = vmatpush.msra.mxu1 %v81_v34  ;;  %212 = vmatpush.msra.mxu3 %v85_v29 }
  0x25   :  { %153 = vmatpush.msrb.mxu0 %v84_v33  ;;  %228 = vmatpush.msra.mxu2 %v86_v31 }
  0x26   :  { %213 = vmatpush.msra.mxu3 %v83_v32  ;;  %126 = vmatpush.msra.mxu1 %v79_v36 }
  0x27   :  { %154 = vmatpush.msrb.mxu0 %v82_v35  ;;  %229 = vmatpush.msra.mxu2 %v84_v33 }
  0x28   :  { %214 = vmatpush.msra.mxu3 %v81_v34 }
  0x29   :  { %230 = vmatpush.msra.mxu2 %v82_v35  ;;  %155 = vmatpush.msrb.mxu0 %v80_v37 }
  0x2a   :  { %215 = vmatpush.msra.mxu3 %v79_v36 }
  0x2b   :  { %231 = vmatpush.msra.mxu2 %v80_v37 }
  0x87   :  { %v67_v38 = vpop.f32.mrf.mxu0 }
  0x88   :  { %127 = vmatmul.f32.vlgmr.msra.gmra.mxu1 %v67_v38  ;;  %156 = vmatmul.f32.vlgmr.msrb.gmra.mxu0 %v67_v38 }
  0x8f   :  { %v70_v39 = vpop.f32.mrf.mxu0 }
  0x90   :  { %130 = vmatmul.f32.vlgmr.msra.gmra.mxu3 %v70_v39  ;;  %159 = vmatmul.f32.vlgmr.msra.gmra.mxu2 %v70_v39 }
  0x97   :  { %v73_v40 = vpop.f32.mrf.mxu0 }
  0x98   :  { %133 = vmatmul.f32.gmra.mxu3 %v73_v40  ;;  %162 = vmatmul.f32.gmra.mxu2 %v73_v40 }
  0x9f   :  { %v76_v41 = vpop.f32.mrf.mxu0 }
  0xa0   :  { %136 = vmatmul.f32.gmra.mxu3 %v76_v41  ;;  %165 = vmatmul.f32.gmra.mxu2 %v76_v41 }
 0x105   :  { %v128_v42 = vpop.f32.mrf.mxu1  ;;  %v157_v43 = vpop.f32.mrf.mxu0 }
 0x106   :  { %169 = vst [vmem:[#allocation5] sm:$0xff] %v128_v42 }
 0x107   :  { %170 = vst [vmem:[#allocation5 + $0x8] sm:$0xff] %v157_v43 }
 0x113   :  { %v131_v44 = vpop.f32.mrf.mxu3  ;;  %v160_v45 = vpop.f32.mrf.mxu2 }
 0x114   :  { %171 = vst [vmem:[#allocation5 + $0x10] sm:$0xff] %v131_v44 }
 0x115   :  { %172 = vst [vmem:[#allocation5 + $0x18] sm:$0xff] %v160_v45 }
 0x11b   :  { %v134_v46 = vpop.f32.mrf.mxu3  ;;  %v163_v47 = vpop.f32.mrf.mxu2 }
 0x11c   :  { %173 = vst [vmem:[#allocation5 + $0x20] sm:$0xff] %v134_v46 }
 0x11d   :  { %174 = vst [vmem:[#allocation5 + $0x28] sm:$0xff] %v163_v47 }
 0x123   :  { %v137_v48 = vpop.f32.mrf.mxu3  ;;  %v166_v49 = vpop.f32.mrf.mxu2 }
 0x124   :  { %175 = vst [vmem:[#allocation5 + $0x30] sm:$0xff] %v137_v48 }
 0x125   :  { %176 = vst [vmem:[#allocation5 + $0x38] sm:$0xff] %v166_v49 }
 0x126   :  { %189 = dma.vmem_to_hbm [thread:$0]  %s182_s29, 1024, %s184_s5, [#allocation4], %s289_s17, %s289_s17, %s290_s18  }
 0x127   :  { %286 = dma.done.wait [#allocation4], 1024  }
 0x128   :  { %287 = vsyncadd [#allocation4], 4294966272 }
 0x129   :  { %194 = vsyncpa [#allocation3], 1 }
 0x12a   :  { %195 = vsyncpa [#allocation4], 1 }

</bundles_post_ra>
